<compile_context>
chip_gen: v7x
topology: tpu7x:2x2x1
jax: 0.10.0
libtpu: 0.0.40
codegen_flags: <defaults>
</compile_context>

<pallas_src>
import functools

import jax
import jax.numpy as jnp
from jax.experimental import pallas as pl
from jax.experimental.pallas import tpu as pltpu


def _round_up(n, m):
    return ((n + m - 1) // m) * m


@functools.lru_cache(maxsize=1)
def _bf16_relu_supported():
    """bf16 VALU exists on v6e/v7x; v5e (and older) should keep f32 ReLU."""
    try:
        kind = jax.devices()[0].device_kind.lower()
    except Exception:
        return False
    return ("v6" in kind) or ("v7" in kind)


def _choose_tile_m(B, tile_m_max):
    """Batch tile: large enough to amortize per-step pipeline overhead, while
    keeping >=2 grid steps (v7x has 2 TensorCores sharded over the 'parallel'
    batch axis) and <=25% padded rows."""
    if B <= 256:
        # Single grid step; round rows up to bf16 sublane packing (16).
        return _round_up(max(B, 16), 16)
    for cand in (4096, 2048, 1024, 512):
        if cand > tile_m_max:
            continue
        Bp = _round_up(B, cand)
        if Bp // cand >= 2 and 4 * (Bp - B) <= Bp:
            return cand
    return 256


def mlp_kernel(relu_in_bf16, xe_ref,
               w1_ref, b1_ref, w2_ref, b2_ref, w3_ref, b3_ref,
               w4_ref, b4_ref, w5_ref, b5_ref, out_ref):
    def relu_to_bf16(h):
        if relu_in_bf16:
            # v6e/v7x: bf16 max processes 2048 elems/vreg; identical result
            # since max(.,0) commutes with the monotone f32->bf16 cast.
            return jnp.maximum(h.astype(jnp.bfloat16), jnp.bfloat16(0))
        # v5e: no bf16 VALU -> ReLU on the f32 accumulator, then cast.
        return jnp.maximum(h, 0.0).astype(jnp.bfloat16)

    # Layer 1: concat([x, embed]) already merged into a single [in+embed, 256] W1.
    h = jnp.dot(xe_ref[...], w1_ref[...],
                preferred_element_type=jnp.float32) + b1_ref[...]
    h = relu_to_bf16(h)                                            # [tm, 256]
    # Dropout(0.1): identity at inference.
    h = jnp.dot(h, w2_ref[...], preferred_element_type=jnp.float32) + b2_ref[...]
    h = relu_to_bf16(h)                                            # [tm, 512]
    h = jnp.dot(h, w3_ref[...], preferred_element_type=jnp.float32) + b3_ref[...]
    h = relu_to_bf16(h)                                            # [tm, 512]
    h = jnp.dot(h, w4_ref[...], preferred_element_type=jnp.float32) + b4_ref[...]
    h = jnp.maximum(h, 0.0)                                        # [tm, 256] f32
    # Head (N=1): VPU multiply + XLU lane reduction (keeps the 1-column matmul
    # off the MXU), transposed to a lane-dense [1, tm] row -> unmasked store.
    w5 = w5_ref[...].astype(jnp.float32)                           # [1, 256]
    y = jnp.sum(h * w5, axis=-1, keepdims=True)                    # [tm, 1]
    out_ref[...] = jnp.transpose(y) + b5_ref[...]                  # [1, tm]


@functools.partial(jax.jit, static_argnames=("tile_m",))
def context_aware_mlp(x, sid, params, *, tile_m=2048):
    """x: [B, input_dim] f32, sid: [B] int32 -> [B, 1] f32."""
    B, input_dim = x.shape
    embed_dim = params["embed"].shape[1]

    # Embedding row-gather + layer-1 concat stay in plain JAX (one tiny fused
    # XLA op feeding a single [tm, in+embed] activation stream).
    # TODO(synk): jnp.take clamps out-of-range ids instead of erroring like
    # torch.nn.Embedding; for tiny latency-bound batches the gather could also
    # be fused into the kernel (VMEM-resident table + in-kernel take).
    e = jnp.take(params["embed"], sid, axis=0)                     # [B, embed] bf16
    xe = jnp.concatenate([x.astype(jnp.bfloat16), e], axis=1)      # [B, in+embed]

    tm = _choose_tile_m(B, tile_m)
    Bp = _round_up(B, tm)
    if Bp != B:
        # Padded rows run through the MLP and are sliced off below.
        xe = jnp.pad(xe, ((0, Bp - B), (0, 0)))

    k_in = input_dim + embed_dim
    relu_in_bf16 = _bf16_relu_supported()

    def const_spec(arr):
        # Block index never changes -> single buffer (no pipelining benefit),
        # keeps the ~1 MiB of weights VMEM-resident without double allocation.
        return pl.BlockSpec(arr.shape, lambda i: (0, 0),
                            pipeline_mode=pl.Buffered(1))

    weights = (params["w1"], params["b1"], params["w2"], params["b2"],
               params["w3"], params["b3"], params["w4"], params["b4"],
               params["w5"], params["b5"])

    in_specs = ([pl.BlockSpec((tm, k_in), lambda i: (i, 0))]
                + [const_spec(w) for w in weights])
    # Lane-dense output: (1, Bp) slab, one (1, tm) row block per grid step.
    out_spec = pl.BlockSpec((1, tm), lambda i: (0, i))

    flops = 2 * Bp * (k_in * 256 + 256 * 512 + 512 * 512 + 512 * 256 + 256)
    bytes_accessed = int(xe.size * xe.dtype.itemsize
                         + sum(int(w.size) * w.dtype.itemsize for w in weights)
                         + Bp * 4)
    cost = pl.CostEstimate(flops=flops, transcendentals=0,
                           bytes_accessed=bytes_accessed)

    if tm >= 4096:
        vmem_limit = 48 * 1024 * 1024      # stay under v7x's 64 MiB ceiling
    elif tm >= 1024:
        vmem_limit = 32 * 1024 * 1024      # v5e default (16 MiB) is too small
    else:
        vmem_limit = None

    out = pl.pallas_call(
        functools.partial(mlp_kernel, relu_in_bf16),
        out_shape=jax.ShapeDtypeStruct((1, Bp), jnp.float32),
        grid=(Bp // tm,),
        in_specs=in_specs,
        out_specs=out_spec,
        compiler_params=pltpu.CompilerParams(
            dimension_semantics=("parallel",),
            vmem_limit_bytes=vmem_limit),
        cost_estimate=cost,
    )(xe, *weights)
    return out[0, :B][:, None]


def init_params(key, input_dim=5, scenario_count=10000, embed_dim=16):
    dims = [input_dim + embed_dim, 256, 512, 512, 256, 1]
    keys = jax.random.split(key, 1 + 2 * (len(dims) - 1))
    params = {"embed": jax.random.normal(keys[0], (scenario_count, embed_dim),
                                         jnp.float32).astype(jnp.bfloat16)}
    for i in range(len(dims) - 1):
        fan_in = dims[i]
        scale = fan_in ** -0.5
        # Weights stored [in, out] (transpose of nn.Linear) so the kernel does h @ W.
        w = jax.random.uniform(keys[1 + 2 * i], (dims[i], dims[i + 1]),
                               jnp.float32, -scale, scale)
        b = jax.random.uniform(keys[2 + 2 * i], (1, dims[i + 1]),
                               jnp.float32, -scale, scale)
        if i == len(dims) - 2:
            # Head stored row-major [1, 256] for the VPU reduction in the kernel.
            params["w5"] = w.T.astype(jnp.bfloat16)
            params["b5"] = b
        else:
            params[f"w{i + 1}"] = w.astype(jnp.bfloat16)
            params[f"b{i + 1}"] = b                                 # f32 [1, out]
    return params


def reference(x, sid, params):
    """Pure-JAX f32 reference using the same bf16-rounded weights/inputs.
    (Weights are bf16 by design for MXU throughput; f32 accumulation in-kernel.)"""
    e = jnp.take(params["embed"], sid, axis=0).astype(jnp.float32)
    xb = x.astype(jnp.bfloat16).astype(jnp.float32)
    h = jnp.concatenate([xb, e], axis=1)
    for i in (1, 2, 3, 4):
        h = jnp.maximum(h @ params[f"w{i}"].astype(jnp.float32) + params[f"b{i}"], 0.0)
    return h @ params["w5"].astype(jnp.float32).T + params["b5"]


if __name__ == "__main__":
    key = jax.random.PRNGKey(0)
    k_param, k_x, k_sid, k_x2, k_sid2 = jax.random.split(key, 5)

    INPUT_DIM, SCENARIOS, EMBED_DIM = 5, 10000, 16
    params = init_params(k_param, INPUT_DIM, SCENARIOS, EMBED_DIM)

    # Small latency-style batch (single grid step, tm rounded to 16 rows).
    B = 8
    x = jax.random.normal(k_x, (B, INPUT_DIM), jnp.float32)
    sid = jax.random.randint(k_sid, (B,), 0, SCENARIOS, jnp.int32)
    out = jax.block_until_ready(context_aware_mlp(x, sid, params))
    ref = jax.block_until_ready(reference(x, sid, params))
    assert out.shape == (B, 1), out.shape
    assert jnp.allclose(out, ref, atol=3e-2, rtol=3e-2), (out, ref)

    # Multi-tile batch (exercises grid > 1, padding and the lane-dense store).
    B2 = 600
    x2 = jax.random.normal(k_x2, (B2, INPUT_DIM), jnp.float32)
    sid2 = jax.random.randint(k_sid2, (B2,), 0, SCENARIOS, jnp.int32)
    out2 = jax.block_until_ready(context_aware_mlp(x2, sid2, params))
    ref2 = jax.block_until_ready(reference(x2, sid2, params))
    assert out2.shape == (B2, 1), out2.shape
    assert jnp.allclose(out2, ref2, atol=3e-2, rtol=3e-2), \
        float(jnp.abs(out2 - ref2).max())

    print("KERNEL_OK")
</pallas_src>

<mosaic_0001>
module attributes {stable_mosaic.version = 11 : i64} {
  func.func @mlp_kernel(%arg0: i32, %arg1: memref<16x21xbf16, #tpu.memory_space<vmem>>, %arg2: memref<21x256xbf16, #tpu.memory_space<vmem>>, %arg3: memref<1x256xf32, #tpu.memory_space<vmem>>, %arg4: memref<256x512xbf16, #tpu.memory_space<vmem>>, %arg5: memref<1x512xf32, #tpu.memory_space<vmem>>, %arg6: memref<512x512xbf16, #tpu.memory_space<vmem>>, %arg7: memref<1x512xf32, #tpu.memory_space<vmem>>, %arg8: memref<512x256xbf16, #tpu.memory_space<vmem>>, %arg9: memref<1x256xf32, #tpu.memory_space<vmem>>, %arg10: memref<1x256xbf16, #tpu.memory_space<vmem>>, %arg11: memref<1x1xf32, #tpu.memory_space<vmem>>, %arg12: memref<1x16xf32, #tpu.memory_space<vmem>>) attributes {dimension_semantics = [#tpu.dimension_semantics<parallel>], iteration_bounds = array<i64: 1>, scalar_prefetch = 0 : i64, scratch_operands = 0 : i64, tpu.core_type = #tpu.core_type<tc>, window_params = [{transform_indices = @transform_0, window_bounds = array<i64: 16, 21>}, {pipeline_mode = #tpu.pipeline_mode<synchronous>, transform_indices = @transform_1, window_bounds = array<i64: 21, 256>}, {pipeline_mode = #tpu.pipeline_mode<synchronous>, transform_indices = @transform_2, window_bounds = array<i64: 1, 256>}, {pipeline_mode = #tpu.pipeline_mode<synchronous>, transform_indices = @transform_3, window_bounds = array<i64: 256, 512>}, {pipeline_mode = #tpu.pipeline_mode<synchronous>, transform_indices = @transform_4, window_bounds = array<i64: 1, 512>}, {pipeline_mode = #tpu.pipeline_mode<synchronous>, transform_indices = @transform_5, window_bounds = array<i64: 512, 512>}, {pipeline_mode = #tpu.pipeline_mode<synchronous>, transform_indices = @transform_6, window_bounds = array<i64: 1, 512>}, {pipeline_mode = #tpu.pipeline_mode<synchronous>, transform_indices = @transform_7, window_bounds = array<i64: 512, 256>}, {pipeline_mode = #tpu.pipeline_mode<synchronous>, transform_indices = @transform_8, window_bounds = array<i64: 1, 256>}, {pipeline_mode = #tpu.pipeline_mode<synchronous>, transform_indices = @transform_9, window_bounds = array<i64: 1, 256>}, {pipeline_mode = #tpu.pipeline_mode<synchronous>, transform_indices = @transform_10, window_bounds = array<i64: 1, 1>}, {transform_indices = @transform_11, window_bounds = array<i64: 1, 16>}]} {
    %c0 = arith.constant 0 : index
    %c0_0 = arith.constant 0 : index
    %0 = vector.load %arg1[%c0, %c0_0] : memref<16x21xbf16, #tpu.memory_space<vmem>>, vector<16x21xbf16>
    %c0_1 = arith.constant 0 : index
    %c0_2 = arith.constant 0 : index
    %1 = vector.load %arg2[%c0_1, %c0_2] : memref<21x256xbf16, #tpu.memory_space<vmem>>, vector<21x256xbf16>
    %cst = arith.constant dense<0.000000e+00> : vector<16x256xf32>
    %2 = tpu.matmul %0, %1, %cst {dimension_numbers = #tpu.dot_dimension_numbers<[1], [0], [0], [1], [0, 0, 1, 1], [], []>} : vector<16x21xbf16>, vector<21x256xbf16>, vector<16x256xf32> -> vector<16x256xf32>
    %c0_3 = arith.constant 0 : index
    %c0_4 = arith.constant 0 : index
    %3 = vector.load %arg3[%c0_3, %c0_4] : memref<1x256xf32, #tpu.memory_space<vmem>>, vector<1x256xf32>
    %4 = vector.broadcast %3 : vector<1x256xf32> to vector<16x256xf32>
    %5 = arith.addf %2, %4 : vector<16x256xf32>
    %cst_5 = arith.constant 0.000000e+00 : f32
    %6 = vector.broadcast %cst_5 : f32 to vector<16x256xf32>
    %7 = arith.maximumf %5, %6 : vector<16x256xf32>
    %8 = arith.truncf %7 : vector<16x256xf32> to vector<16x256xbf16>
    %c0_6 = arith.constant 0 : index
    %c0_7 = arith.constant 0 : index
    %9 = vector.load %arg4[%c0_6, %c0_7] : memref<256x512xbf16, #tpu.memory_space<vmem>>, vector<256x512xbf16>
    %cst_8 = arith.constant dense<0.000000e+00> : vector<16x512xf32>
    %10 = tpu.matmul %8, %9, %cst_8 {dimension_numbers = #tpu.dot_dimension_numbers<[1], [0], [0], [1], [0, 0, 1, 1], [], []>} : vector<16x256xbf16>, vector<256x512xbf16>, vector<16x512xf32> -> vector<16x512xf32>
    %c0_9 = arith.constant 0 : index
    %c0_10 = arith.constant 0 : index
    %11 = vector.load %arg5[%c0_9, %c0_10] : memref<1x512xf32, #tpu.memory_space<vmem>>, vector<1x512xf32>
    %12 = vector.broadcast %11 : vector<1x512xf32> to vector<16x512xf32>
    %13 = arith.addf %10, %12 : vector<16x512xf32>
    %cst_11 = arith.constant 0.000000e+00 : f32
    %14 = vector.broadcast %cst_11 : f32 to vector<16x512xf32>
    %15 = arith.maximumf %13, %14 : vector<16x512xf32>
    %16 = arith.truncf %15 : vector<16x512xf32> to vector<16x512xbf16>
    %c0_12 = arith.constant 0 : index
    %c0_13 = arith.constant 0 : index
    %17 = vector.load %arg6[%c0_12, %c0_13] : memref<512x512xbf16, #tpu.memory_space<vmem>>, vector<512x512xbf16>
    %cst_14 = arith.constant dense<0.000000e+00> : vector<16x512xf32>
    %18 = tpu.matmul %16, %17, %cst_14 {dimension_numbers = #tpu.dot_dimension_numbers<[1], [0], [0], [1], [0, 0, 1, 1], [], []>} : vector<16x512xbf16>, vector<512x512xbf16>, vector<16x512xf32> -> vector<16x512xf32>
    %c0_15 = arith.constant 0 : index
    %c0_16 = arith.constant 0 : index
    %19 = vector.load %arg7[%c0_15, %c0_16] : memref<1x512xf32, #tpu.memory_space<vmem>>, vector<1x512xf32>
    %20 = vector.broadcast %19 : vector<1x512xf32> to vector<16x512xf32>
    %21 = arith.addf %18, %20 : vector<16x512xf32>
    %cst_17 = arith.constant 0.000000e+00 : f32
    %22 = vector.broadcast %cst_17 : f32 to vector<16x512xf32>
    %23 = arith.maximumf %21, %22 : vector<16x512xf32>
    %24 = arith.truncf %23 : vector<16x512xf32> to vector<16x512xbf16>
    %c0_18 = arith.constant 0 : index
    %c0_19 = arith.constant 0 : index
    %25 = vector.load %arg8[%c0_18, %c0_19] : memref<512x256xbf16, #tpu.memory_space<vmem>>, vector<512x256xbf16>
    %cst_20 = arith.constant dense<0.000000e+00> : vector<16x256xf32>
    %26 = tpu.matmul %24, %25, %cst_20 {dimension_numbers = #tpu.dot_dimension_numbers<[1], [0], [0], [1], [0, 0, 1, 1], [], []>} : vector<16x512xbf16>, vector<512x256xbf16>, vector<16x256xf32> -> vector<16x256xf32>
    %c0_21 = arith.constant 0 : index
    %c0_22 = arith.constant 0 : index
    %27 = vector.load %arg9[%c0_21, %c0_22] : memref<1x256xf32, #tpu.memory_space<vmem>>, vector<1x256xf32>
    %28 = vector.broadcast %27 : vector<1x256xf32> to vector<16x256xf32>
    %29 = arith.addf %26, %28 : vector<16x256xf32>
    %cst_23 = arith.constant 0.000000e+00 : f32
    %30 = vector.broadcast %cst_23 : f32 to vector<16x256xf32>
    %31 = arith.maximumf %29, %30 : vector<16x256xf32>
    %c0_24 = arith.constant 0 : index
    %c0_25 = arith.constant 0 : index
    %32 = vector.load %arg10[%c0_24, %c0_25] : memref<1x256xbf16, #tpu.memory_space<vmem>>, vector<1x256xbf16>
    %33 = arith.extf %32 : vector<1x256xbf16> to vector<1x256xf32>
    %34 = vector.broadcast %33 : vector<1x256xf32> to vector<16x256xf32>
    %35 = arith.mulf %31, %34 : vector<16x256xf32>
    %cst_26 = arith.constant dense<0.000000e+00> : vector<16xf32>
    %36 = vector.multi_reduction <add>, %35, %cst_26 [1] : vector<16x256xf32> to vector<16xf32>
    %37 = vector.shape_cast %36 : vector<16xf32> to vector<16x1xf32>
    %38 = tpu.transpose %37, [1, 0] : vector<16x1xf32> -> vector<1x16xf32>
    %c0_27 = arith.constant 0 : index
    %c0_28 = arith.constant 0 : index
    %39 = vector.load %arg11[%c0_27, %c0_28] : memref<1x1xf32, #tpu.memory_space<vmem>>, vector<1x1xf32>
    %40 = vector.broadcast %39 : vector<1x1xf32> to vector<1x16xf32>
    %41 = arith.addf %38, %40 : vector<1x16xf32>
    %c0_29 = arith.constant 0 : index
    %c0_30 = arith.constant 0 : index
    %42 = vector.load %arg12[%c0_29, %c0_30] : memref<1x16xf32, #tpu.memory_space<vmem>>, vector<1x16xf32>
    tpu.vector_store %arg12[%c0_29, %c0_30], %41 {strides = array<i32>} : memref<1x16xf32, #tpu.memory_space<vmem>>, vector<1x16xf32>,
    return
  }
  func.func @transform_0(%arg0: i32) -> (i32, i32) {
    %c0_i32 = arith.constant 0 : i32
    %c0_i32_0 = arith.constant 0 : i32
    return %arg0, %c0_i32 : i32, i32
  }
  func.func @transform_1(%arg0: i32) -> (i32, i32) {
    %c0_i32 = arith.constant 0 : i32
    %c0_i32_0 = arith.constant 0 : i32
    %c0_i32_1 = arith.constant 0 : i32
    return %c0_i32, %c0_i32_0 : i32, i32
  }
  func.func @transform_2(%arg0: i32) -> (i32, i32) {
    %c0_i32 = arith.constant 0 : i32
    %c0_i32_0 = arith.constant 0 : i32
    %c0_i32_1 = arith.constant 0 : i32
    return %c0_i32, %c0_i32_0 : i32, i32
  }
  func.func @transform_3(%arg0: i32) -> (i32, i32) {
    %c0_i32 = arith.constant 0 : i32
    %c0_i32_0 = arith.constant 0 : i32
    %c0_i32_1 = arith.constant 0 : i32
    return %c0_i32, %c0_i32_0 : i32, i32
  }
  func.func @transform_4(%arg0: i32) -> (i32, i32) {
    %c0_i32 = arith.constant 0 : i32
    %c0_i32_0 = arith.constant 0 : i32
    %c0_i32_1 = arith.constant 0 : i32
    return %c0_i32, %c0_i32_0 : i32, i32
  }
  func.func @transform_5(%arg0: i32) -> (i32, i32) {
    %c0_i32 = arith.constant 0 : i32
    %c0_i32_0 = arith.constant 0 : i32
    %c0_i32_1 = arith.constant 0 : i32
    return %c0_i32, %c0_i32_0 : i32, i32
  }
  func.func @transform_6(%arg0: i32) -> (i32, i32) {
    %c0_i32 = arith.constant 0 : i32
    %c0_i32_0 = arith.constant 0 : i32
    %c0_i32_1 = arith.constant 0 : i32
    return %c0_i32, %c0_i32_0 : i32, i32
  }
  func.func @transform_7(%arg0: i32) -> (i32, i32) {
    %c0_i32 = arith.constant 0 : i32
    %c0_i32_0 = arith.constant 0 : i32
    %c0_i32_1 = arith.constant 0 : i32
    return %c0_i32, %c0_i32_0 : i32, i32
  }
  func.func @transform_8(%arg0: i32) -> (i32, i32) {
    %c0_i32 = arith.constant 0 : i32
    %c0_i32_0 = arith.constant 0 : i32
    %c0_i32_1 = arith.constant 0 : i32
    return %c0_i32, %c0_i32_0 : i32, i32
  }
  func.func @transform_9(%arg0: i32) -> (i32, i32) {
    %c0_i32 = arith.constant 0 : i32
    %c0_i32_0 = arith.constant 0 : i32
    %c0_i32_1 = arith.constant 0 : i32
    return %c0_i32, %c0_i32_0 : i32, i32
  }
  func.func @transform_10(%arg0: i32) -> (i32, i32) {
    %c0_i32 = arith.constant 0 : i32
    %c0_i32_0 = arith.constant 0 : i32
    %c0_i32_1 = arith.constant 0 : i32
    return %c0_i32, %c0_i32_0 : i32, i32
  }
  func.func @transform_11(%arg0: i32) -> (i32, i32) {
    %c0_i32 = arith.constant 0 : i32
    %c0_i32_0 = arith.constant 0 : i32
    return %c0_i32, %arg0 : i32, i32
  }
}

</mosaic_0001>

<bundles_post_ra>
// kernel: context_aware_mlp.1
= control target key start
LH: loop header
LB: loop body
LE: loop exit
PB: predicated region body
PF: predicated region fallthrough
CT: control target
= control target key end

     0   :  { %vm82_vm0 = vcmask 1041408   ;;  %vm83_vm1 = vcmask 1042432   ;;  %v2866_v1 = vmov 65535   ;;  %v2867_v3 = vmov 0   ;;  %s3773_s1 = inlined_call_operand.vmem [shape: bf16[21,256], index: 1, kind: input, shape index: {}]   ;;  %s3774_s0 = inlined_call_operand.vmem [shape: bf16[16,21], index: 0, kind: input, shape index: {}]   ;;  %s3775_s3 = inlined_call_operand.vmem [shape: bf16[256,512], index: 3, kind: input, shape index: {}]   ;;  %s3776_s5 = inlined_call_operand.vmem [shape: bf16[512,512], index: 5, kind: input, shape index: {}]   ;;  %s3777_s2 = inlined_call_operand.vmem [shape: f32[1,256], index: 2, kind: input, shape index: {}]   ;;  %s3778_s7 = inlined_call_operand.vmem [shape: bf16[512,256], index: 7, kind: input, shape index: {}]   ;;  %s3779_s4 = inlined_call_operand.vmem [shape: f32[1,512], index: 4, kind: input, shape index: {}]   ;;  %s3780_s6 = inlined_call_operand.vmem [shape: f32[1,512], index: 6, kind: input, shape index: {}]   ;;  %s3781_s10 = inlined_call_operand.<no memory space> [shape: f32[1,1], index: 10, kind: input, shape index: {}]   ;;  %s3782_s9 = inlined_call_operand.vmem [shape: bf16[1,256], index: 9, kind: input, shape index: {}]   ;;  %s3783_s8 = inlined_call_operand.vmem [shape: f32[1,256], index: 8, kind: input, shape index: {}]   ;;  %s3784_s11 = inlined_call_operand.vmem [shape: f32[1,16], index: 11, kind: output, shape index: {}]  }
   0x1   :  { %v45_v0 = vld [vmem:[%s3773_s1 + $0x10] sm:$0x77]  ;;  %v84_v2 = vsel %vm82_vm0, 4294967295, %v2866_v1  ;;  %124 = vmatprep.mubr.bf16.mxu0 %v2867_v3  ;;  %2474 = vset.pattern.permute.xlu1 %v2867_v3  ;;  %v2476_v4 = vld [vmem:[%s3773_s1 + $0x4] ss:$8 sps:$4 sm:$0xff]   ;;  %vm78_vm2 = vcmask 171008   ;;  %v48_v1 = vlaneseq }
   0x2   :  { %v2478_v5 = vld [vmem:[%s3773_s1] ss:$8 sps:$4 sm:$0xff]   ;;  %v2189_v6 = vcombine.high %v45_v0, %v45_v0  ;;  %v85_v7 = vsel %vm83_vm1, %v84_v2, 0  ;;  %v2188_v8 = vcombine.low %v45_v0, %v45_v0  ;;  %2475 = vset.pattern.permute.xlu0 %v2867_v3  ;;  %92 = vmatprep.subr.bf16.mxu0 %v2476_v4  ;;  %v2484_v11 = vld [vmem:[%s3775_s3 + $0x4] ss:$16 sps:$4 sm:$0xff]   ;;  %vm2179_vm3 = vcmask 122880  }
   0x3   :  { %93 = vmatpush1.bf16.msra.mxu0 %v2478_v5  ;;  %v2481_v12 = vld [vmem:[%s3774_s0] sm:$0xff]   ;;  %v2532_v44 = vld [vmem:[%s3775_s3 + $0xc] ss:$16 sps:$4 sm:$0xff]   ;;  %v3105_v4 = vshrl.u32 %v48_v1, 7 }
   0x4   :  { %v90_v9 = vand.u32 %v2189_v6, %v85_v7  ;;  %v87_v10 = vand.u32 %v2188_v8, %v85_v7  ;;  %v2482_v13 = vld [vmem:[%s3775_s3] ss:$16 sps:$4 sm:$0xff]   ;;  %v2487_v14 = vld [vmem:[%s3775_s3 + $0x24] ss:$16 sps:$4 sm:$0xff]   ;;  %v2594_v1 = vld [vmem:[%s3776_s5 + $0x4c] ss:$16 sps:$4 sm:$0xff]  }
   0x5   :  { %v2485_v15 = vld [vmem:[%s3775_s3 + $0x20] ss:$16 sps:$4 sm:$0xff]   ;;  %v2490_v16 = vld [vmem:[%s3775_s3 + $0x44] ss:$16 sps:$4 sm:$0xff]   ;;  %v3117_v8 = vsub.s32 0, %v3105_v4 }
   0x6   :  { %94 = vmatprep.subr.bf16.mxu0 %v90_v9  ;;  %v2488_v17 = vld [vmem:[%s3775_s3 + $0x40] ss:$16 sps:$4 sm:$0xff]   ;;  %v2493_v18 = vld [vmem:[%s3775_s3 + $0x64] ss:$16 sps:$4 sm:$0xff]  }
   0x7   :  { %95 = vmatpush1.bf16.msra.mxu0 %v87_v10  ;;  %v2491_v19 = vld [vmem:[%s3775_s3 + $0x60] ss:$16 sps:$4 sm:$0xff]   ;;  %v2496_v20 = vld [vmem:[%s3775_s3 + $0x84] ss:$16 sps:$4 sm:$0xff]   ;;  %v3123_v10 = vsub.s32 1, %v3105_v4 }
   0x8   :  { %547 = vmatprep.subr.bf16.mxu0 %v2484_v11  ;;  %v2494_v21 = vld [vmem:[%s3775_s3 + $0x80] ss:$16 sps:$4 sm:$0xff]   ;;  %v2499_v22 = vld [vmem:[%s3775_s3 + $0xa4] ss:$16 sps:$4 sm:$0xff]  }
   0x9   :  { %v2497_v23 = vld [vmem:[%s3775_s3 + $0xa0] ss:$16 sps:$4 sm:$0xff]   ;;  %v2502_v24 = vld [vmem:[%s3775_s3 + $0xc4] ss:$16 sps:$4 sm:$0xff]  }
   0xa   :  { %2190 = vmatmul.mubr.msk.bf16.vlgmr.msra.gmra.mrb[0].mxu0 %vm78_vm2, %v2481_v12  ;;  %v2500_v25 = vld [vmem:[%s3775_s3 + $0xc0] ss:$16 sps:$4 sm:$0xff]   ;;  %v2505_v26 = vld [vmem:[%s3775_s3 + $0xe4] ss:$16 sps:$4 sm:$0xff]  }
   0xb   :  { %548 = vmatpush1.bf16.msra.mxu0 %v2482_v13  ;;  %v2503_v27 = vld [vmem:[%s3775_s3 + $0xe0] ss:$16 sps:$4 sm:$0xff]   ;;  %v2508_v28 = vld [vmem:[%s3775_s3 + $0x104] ss:$16 sps:$4 sm:$0xff]  }
   0xc   :  { %549 = vmatprep.subr.bf16.mxu0 %v2487_v14  ;;  %v2506_v29 = vld [vmem:[%s3775_s3 + $0x100] ss:$16 sps:$4 sm:$0xff]   ;;  %v2511_v30 = vld [vmem:[%s3775_s3 + $0x124] ss:$16 sps:$4 sm:$0xff]  }
   0xd   :  { %v2509_v31 = vld [vmem:[%s3775_s3 + $0x120] ss:$16 sps:$4 sm:$0xff]   ;;  %v2514_v32 = vld [vmem:[%s3775_s3 + $0x144] ss:$16 sps:$4 sm:$0xff]  }
   0xe   :  { %v2512_v33 = vld [vmem:[%s3775_s3 + $0x140] ss:$16 sps:$4 sm:$0xff]   ;;  %v2517_v34 = vld [vmem:[%s3775_s3 + $0x164] ss:$16 sps:$4 sm:$0xff]  }
   0xf   :  { %550 = vmatpush1.bf16.msra.mxu0 %v2485_v15  ;;  %v2515_v35 = vld [vmem:[%s3775_s3 + $0x160] ss:$16 sps:$4 sm:$0xff]   ;;  %v2520_v36 = vld [vmem:[%s3775_s3 + $0x184] ss:$16 sps:$4 sm:$0xff]  }
  0x10   :  { %551 = vmatprep.subr.bf16.mxu0 %v2490_v16  ;;  %v2518_v37 = vld [vmem:[%s3775_s3 + $0x180] ss:$16 sps:$4 sm:$0xff]   ;;  %v2523_v38 = vld [vmem:[%s3775_s3 + $0x1a4] ss:$16 sps:$4 sm:$0xff]  }
  0x11   :  { %v2521_v39 = vld [vmem:[%s3775_s3 + $0x1a0] ss:$16 sps:$4 sm:$0xff]   ;;  %v2526_v40 = vld [vmem:[%s3775_s3 + $0x1c4] ss:$16 sps:$4 sm:$0xff]  }
  0x12   :  { %v2524_v41 = vld [vmem:[%s3775_s3 + $0x1c0] ss:$16 sps:$4 sm:$0xff]   ;;  %v2529_v42 = vld [vmem:[%s3775_s3 + $0x1e4] ss:$16 sps:$4 sm:$0xff]  }
  0x13   :  { %552 = vmatpush1.bf16.msra.mxu0 %v2488_v17  ;;  %v2527_v43 = vld [vmem:[%s3775_s3 + $0x1e0] ss:$16 sps:$4 sm:$0xff]   ;;  %v2578_v45 = vld [vmem:[%s3776_s5 + $0x4] ss:$16 sps:$4 sm:$0xff]  }
  0x14   :  { %553 = vmatprep.subr.bf16.mxu0 %v2493_v18  ;;  %1435 = vmatprep.subr.bf16.mxu1 %v2578_v45  ;;  %v2583_v46 = vld [vmem:[%s3776_s5] ss:$16 sps:$4 sm:$0xff]   ;;  %v2584_v47 = vld [vmem:[%s3776_s5 + $0x24] ss:$16 sps:$4 sm:$0xff]   ;;  %v2556_v45 = vld [vmem:[%s3775_s3 + $0x10c] ss:$16 sps:$4 sm:$0xff]  }
  0x15   :  { %1436 = vmatpush1.bf16.msra.mxu1 %v2583_v46  ;;  %v2589_v48 = vld [vmem:[%s3776_s5 + $0x20] ss:$16 sps:$4 sm:$0xff]   ;;  %v2590_v49 = vld [vmem:[%s3776_s5 + $0x44] ss:$16 sps:$4 sm:$0xff]   ;;  %v2554_v46 = vld [vmem:[%s3775_s3 + $0x108] ss:$16 sps:$4 sm:$0xff]  }
  0x16   :  { %1437 = vmatprep.subr.bf16.mxu1 %v2584_v47  ;;  %v2595_v50 = vld [vmem:[%s3776_s5 + $0x40] ss:$16 sps:$4 sm:$0xff]   ;;  %v2596_v51 = vld [vmem:[%s3776_s5 + $0x64] ss:$16 sps:$4 sm:$0xff]   ;;  %v2559_v47 = vld [vmem:[%s3775_s3 + $0x12c] ss:$16 sps:$4 sm:$0xff]  }
  0x17   :  { %554 = vmatpush1.bf16.msra.mxu0 %v2491_v19  ;;  %v2601_v52 = vld [vmem:[%s3776_s5 + $0x60] ss:$16 sps:$4 sm:$0xff]   ;;  %v2602_v53 = vld [vmem:[%s3776_s5 + $0x84] ss:$16 sps:$4 sm:$0xff]  }
  0x18   :  { %555 = vmatprep.subr.bf16.mxu0 %v2496_v20  ;;  %v2607_v54 = vld [vmem:[%s3776_s5 + $0x80] ss:$16 sps:$4 sm:$0xff]   ;;  %v2608_v55 = vld [vmem:[%s3776_s5 + $0xa4] ss:$16 sps:$4 sm:$0xff]  }
  0x19   :  { %1438 = vmatpush1.bf16.msra.mxu1 %v2589_v48  ;;  %v2613_v56 = vld [vmem:[%s3776_s5 + $0xa0] ss:$16 sps:$4 sm:$0xff]   ;;  %v2614_v57 = vld [vmem:[%s3776_s5 + $0xc4] ss:$16 sps:$4 sm:$0xff]   ;;  %v2557_v48 = vld [vmem:[%s3775_s3 + $0x128] ss:$16 sps:$4 sm:$0xff]  }
  0x1a   :  { %1439 = vmatprep.subr.bf16.mxu1 %v2590_v49  ;;  %v2619_v58 = vld [vmem:[%s3776_s5 + $0xc0] ss:$16 sps:$4 sm:$0xff]   ;;  %v2620_v59 = vld [vmem:[%s3776_s5 + $0xe4] ss:$16 sps:$4 sm:$0xff]   ;;  %v2562_v49 = vld [vmem:[%s3775_s3 + $0x14c] ss:$16 sps:$4 sm:$0xff]  }
  0x1b   :  { %556 = vmatpush1.bf16.msra.mxu0 %v2494_v21  ;;  %v2625_v60 = vld [vmem:[%s3776_s5 + $0xe0] ss:$16 sps:$4 sm:$0xff]   ;;  %v2626_v61 = vld [vmem:[%s3776_s5 + $0x104] ss:$16 sps:$4 sm:$0xff]  }
  0x1c   :  { %557 = vmatprep.subr.bf16.mxu0 %v2499_v22  ;;  %v2631_v62 = vld [vmem:[%s3776_s5 + $0x100] ss:$16 sps:$4 sm:$0xff]   ;;  %v2632_v63 = vld [vmem:[%s3776_s5 + $0x124] ss:$16 sps:$4 sm:$0xff]  }
  0x1d   :  { %1440 = vmatpush1.bf16.msra.mxu1 %v2595_v50  ;;  %v2637_v0 = vld [vmem:[%s3776_s5 + $0x120] ss:$16 sps:$4 sm:$0xff]   ;;  %v2638_v2 = vld [vmem:[%s3776_s5 + $0x144] ss:$16 sps:$4 sm:$0xff]   ;;  %v2560_v50 = vld [vmem:[%s3775_s3 + $0x148] ss:$16 sps:$4 sm:$0xff]  }
  0x1e   :  { %1441 = vmatprep.subr.bf16.mxu1 %v2596_v51  ;;  %v2643_v3 = vld [vmem:[%s3776_s5 + $0x140] ss:$16 sps:$4 sm:$0xff]   ;;  %v2644_v5 = vld [vmem:[%s3776_s5 + $0x164] ss:$16 sps:$4 sm:$0xff]   ;;  %v2565_v51 = vld [vmem:[%s3775_s3 + $0x16c] ss:$16 sps:$4 sm:$0xff]  }
  0x1f   :  { %558 = vmatpush1.bf16.msra.mxu0 %v2497_v23  ;;  %v46_v6 = vld [vmem:[%s3777_s2] sm:$0x3]  ;;  %v2650_v9 = vld [vmem:[%s3776_s5 + $0x184] ss:$16 sps:$4 sm:$0xff]  }
  0x20   :  { %559 = vmatprep.subr.bf16.mxu0 %v2502_v24  ;;  %v2649_v7 = vld [vmem:[%s3776_s5 + $0x160] ss:$16 sps:$4 sm:$0xff]   ;;  %v51_v12 = vrot.slane %v46_v6, %v3117_v8  ;;  %v2656_v13 = vld [vmem:[%s3776_s5 + $0x1a4] ss:$16 sps:$4 sm:$0xff]   ;;  %v55_v14 = vrot.slane %v46_v6, %v3123_v10  ;;  %v2606_v6 = vld [vmem:[%s3776_s5 + $0x8c] ss:$16 sps:$4 sm:$0xff]  }
  0x21   :  { %1442 = vmatpush1.bf16.msra.mxu1 %v2601_v52  ;;  %v2655_v11 = vld [vmem:[%s3776_s5 + $0x180] ss:$16 sps:$4 sm:$0xff]   ;;  %v2563_v52 = vld [vmem:[%s3775_s3 + $0x168] ss:$16 sps:$4 sm:$0xff]  }
  0x22   :  { %1443 = vmatprep.subr.bf16.mxu1 %v2602_v53  ;;  %v2661_v15 = vld [vmem:[%s3776_s5 + $0x1a0] ss:$16 sps:$4 sm:$0xff]   ;;  %v2568_v53 = vld [vmem:[%s3775_s3 + $0x18c] ss:$16 sps:$4 sm:$0xff]  }
  0x23   :  { %560 = vmatpush1.bf16.msra.mxu0 %v2500_v25 }
  0x24   :  { %561 = vmatprep.subr.bf16.mxu0 %v2505_v26 }
  0x25   :  { %1444 = vmatpush1.bf16.msra.mxu1 %v2607_v54  ;;  %v2566_v54 = vld [vmem:[%s3775_s3 + $0x188] ss:$16 sps:$4 sm:$0xff]  }
  0x26   :  { %1445 = vmatprep.subr.bf16.mxu1 %v2608_v55  ;;  %v2571_v55 = vld [vmem:[%s3775_s3 + $0x1ac] ss:$16 sps:$4 sm:$0xff]  }
  0x27   :  { %562 = vmatpush1.bf16.msra.mxu0 %v2503_v27 }
  0x28   :  { %563 = vmatprep.subr.bf16.mxu0 %v2508_v28  ;;  %v2530_v28 = vld [vmem:[%s3775_s3 + $0x8] ss:$16 sps:$4 sm:$0xff]  }
  0x29   :  { %1446 = vmatpush1.bf16.msra.mxu1 %v2613_v56  ;;  %v2569_v56 = vld [vmem:[%s3775_s3 + $0x1a8] ss:$16 sps:$4 sm:$0xff]  }
  0x2a   :  { %1447 = vmatprep.subr.bf16.mxu1 %v2614_v57  ;;  %v2574_v57 = vld [vmem:[%s3775_s3 + $0x1cc] ss:$16 sps:$4 sm:$0xff]  }
  0x2b   :  { %564 = vmatpush1.bf16.msra.mxu0 %v2506_v29 }
  0x2c   :  { %565 = vmatprep.subr.bf16.mxu0 %v2511_v30 }
  0x2d   :  { %1448 = vmatpush1.bf16.msra.mxu1 %v2619_v58  ;;  %v2572_v58 = vld [vmem:[%s3775_s3 + $0x1c8] ss:$16 sps:$4 sm:$0xff]  }
  0x2e   :  { %1449 = vmatprep.subr.bf16.mxu1 %v2620_v59  ;;  %v2577_v59 = vld [vmem:[%s3775_s3 + $0x1ec] ss:$16 sps:$4 sm:$0xff]  }
  0x2f   :  { %566 = vmatpush1.bf16.msra.mxu0 %v2509_v31  ;;  %v2535_v31 = vld [vmem:[%s3775_s3 + $0x2c] ss:$16 sps:$4 sm:$0xff]  }
  0x30   :  { %567 = vmatprep.subr.bf16.mxu0 %v2514_v32  ;;  %v2533_v32 = vld [vmem:[%s3775_s3 + $0x28] ss:$16 sps:$4 sm:$0xff]  }
  0x31   :  { %1450 = vmatpush1.bf16.msra.mxu1 %v2625_v60  ;;  %v2575_v60 = vld [vmem:[%s3775_s3 + $0x1e8] ss:$16 sps:$4 sm:$0xff]  }
  0x32   :  { %1451 = vmatprep.subr.bf16.mxu1 %v2626_v61  ;;  %v2582_v61 = vld [vmem:[%s3776_s5 + $0xc] ss:$16 sps:$4 sm:$0xff]  }
  0x33   :  { %568 = vmatpush1.bf16.msra.mxu0 %v2512_v33  ;;  %v2538_v33 = vld [vmem:[%s3775_s3 + $0x4c] ss:$16 sps:$4 sm:$0xff]  }
  0x34   :  { %569 = vmatprep.subr.bf16.mxu0 %v2517_v34  ;;  %v2536_v34 = vld [vmem:[%s3775_s3 + $0x48] ss:$16 sps:$4 sm:$0xff]  }
  0x35   :  { %1452 = vmatpush1.bf16.msra.mxu1 %v2631_v62  ;;  %v2580_v62 = vld [vmem:[%s3776_s5 + $0x8] ss:$16 sps:$4 sm:$0xff]  }
  0x36   :  { %1453 = vmatprep.subr.bf16.mxu1 %v2632_v63  ;;  %v2588_v63 = vld [vmem:[%s3776_s5 + $0x2c] ss:$16 sps:$4 sm:$0xff]  }
  0x37   :  { %570 = vmatpush1.bf16.msra.mxu0 %v2515_v35  ;;  %v2541_v35 = vld [vmem:[%s3775_s3 + $0x6c] ss:$16 sps:$4 sm:$0xff]  }
  0x38   :  { %571 = vmatprep.subr.bf16.mxu0 %v2520_v36  ;;  %v2539_v36 = vld [vmem:[%s3775_s3 + $0x68] ss:$16 sps:$4 sm:$0xff]  }
  0x39   :  { %1454 = vmatpush1.bf16.msra.mxu1 %v2637_v0  ;;  %v2586_v0 = vld [vmem:[%s3776_s5 + $0x28] ss:$16 sps:$4 sm:$0xff]  }
  0x3a   :  { %1455 = vmatprep.subr.bf16.mxu1 %v2638_v2  ;;  %v2592_v2 = vld [vmem:[%s3776_s5 + $0x48] ss:$16 sps:$4 sm:$0xff]  }
  0x3b   :  { %572 = vmatpush1.bf16.msra.mxu0 %v2518_v37  ;;  %v2544_v37 = vld [vmem:[%s3775_s3 + $0x8c] ss:$16 sps:$4 sm:$0xff]  }
  0x3c   :  { %573 = vmatprep.subr.bf16.mxu0 %v2523_v38  ;;  %v2542_v38 = vld [vmem:[%s3775_s3 + $0x88] ss:$16 sps:$4 sm:$0xff]  }
  0x3d   :  { %1456 = vmatpush1.bf16.msra.mxu1 %v2643_v3  ;;  %v2600_v3 = vld [vmem:[%s3776_s5 + $0x6c] ss:$16 sps:$4 sm:$0xff]  }
  0x3e   :  { %1457 = vmatprep.subr.bf16.mxu1 %v2644_v5  ;;  %v2598_v5 = vld [vmem:[%s3776_s5 + $0x68] ss:$16 sps:$4 sm:$0xff]  }
  0x3f   :  { %574 = vmatpush1.bf16.msra.mxu0 %v2521_v39  ;;  %v2547_v39 = vld [vmem:[%s3775_s3 + $0xac] ss:$16 sps:$4 sm:$0xff]  }
  0x40   :  { %575 = vmatprep.subr.bf16.mxu0 %v2526_v40  ;;  %v2545_v40 = vld [vmem:[%s3775_s3 + $0xa8] ss:$16 sps:$4 sm:$0xff]  }
  0x41   :  { %1458 = vmatpush1.bf16.msra.mxu1 %v2649_v7  ;;  %v2604_v7 = vld [vmem:[%s3776_s5 + $0x88] ss:$16 sps:$4 sm:$0xff]  }
  0x42   :  { %1459 = vmatprep.subr.bf16.mxu1 %v2650_v9  ;;  %v2612_v9 = vld [vmem:[%s3776_s5 + $0xac] ss:$16 sps:$4 sm:$0xff]  }
  0x43   :  { %576 = vmatpush1.bf16.msra.mxu0 %v2524_v41  ;;  %v2550_v41 = vld [vmem:[%s3775_s3 + $0xcc] ss:$16 sps:$4 sm:$0xff]  }
  0x44   :  { %577 = vmatprep.subr.bf16.mxu0 %v2529_v42  ;;  %v2548_v42 = vld [vmem:[%s3775_s3 + $0xc8] ss:$16 sps:$4 sm:$0xff]  }
  0x45   :  { %1460 = vmatpush1.bf16.msra.mxu1 %v2655_v11  ;;  %v2610_v11 = vld [vmem:[%s3776_s5 + $0xa8] ss:$16 sps:$4 sm:$0xff]  }
  0x46   :  { %1461 = vmatprep.subr.bf16.mxu1 %v2656_v13  ;;  %v2662_v13 = vld [vmem:[%s3776_s5 + $0x1c4] ss:$16 sps:$4 sm:$0xff]  }
  0x47   :  { %578 = vmatpush1.bf16.msra.mxu0 %v2527_v43  ;;  %v2553_v43 = vld [vmem:[%s3775_s3 + $0xec] ss:$16 sps:$4 sm:$0xff]  }
  0x48   :  { %590 = vmatprep.subr.bf16.mxu0 %v2532_v44  ;;  %v2551_v44 = vld [vmem:[%s3775_s3 + $0xe8] ss:$16 sps:$4 sm:$0xff]  }
  0x49   :  { %1462 = vmatpush1.bf16.msra.mxu1 %v2661_v15  ;;  %v2667_v15 = vld [vmem:[%s3776_s5 + $0x1c0] ss:$16 sps:$4 sm:$0xff]  }
  0x4a   :  { %1463 = vmatprep.subr.bf16.mxu1 %v2662_v13  ;;  %v2709_v13 = vld [vmem:[%s3776_s5 + $0x2ac] ss:$16 sps:$4 sm:$0xff]  }
  0x4d   :  { %1464 = vmatpush1.bf16.msra.mxu1 %v2667_v15  ;;  %v2707_v15 = vld [vmem:[%s3776_s5 + $0x2a8] ss:$16 sps:$4 sm:$0xff]  }
  0xdd   :  { %v126_v16 = vpop.f32.mrb[0].mxu0 }
  0xde   :  { %v127_v17 = vadd.f32 %v126_v16, %v51_v12  ;;  %v128_v18 = vpop.f32.mrb[1].mxu0  ;;  %v2624_v16 = vld [vmem:[%s3776_s5 + $0xec] ss:$16 sps:$4 sm:$0xff]  }
  0xdf   :  { %v129_v19 = vadd.f32 %v128_v18, %v55_v14  ;;  %v130_v20 = vpop.f32.mrb[2].mxu0  ;;  %v2622_v18 = vld [vmem:[%s3776_s5 + $0xe8] ss:$16 sps:$4 sm:$0xff]  }
  0xe0   :  { %v131_v21 = vadd.f32 %v130_v20, %v51_v12  ;;  %v132_v22 = vpop.f32.mrb[3].mxu0  ;;  %v135_v24 = vmax.f32 %v127_v17, 0.0  ;;  %v2618_v12 = vld [vmem:[%s3776_s5 + $0xcc] ss:$16 sps:$4 sm:$0xff]   ;;  %v2668_v17 = vld [vmem:[%s3776_s5 + $0x1e4] ss:$16 sps:$4 sm:$0xff]  }
  0xe1   :  { %v133_v23 = vadd.f32 %v132_v22, %v55_v14  ;;  %v136_v26 = vmax.f32 %v129_v19, 0.0  ;;  %v2616_v14 = vld [vmem:[%s3776_s5 + $0xc8] ss:$16 sps:$4 sm:$0xff]   ;;  %v2673_v19 = vld [vmem:[%s3776_s5 + $0x1e0] ss:$16 sps:$4 sm:$0xff]   ;;  %1465 = vmatprep.subr.bf16.mxu1 %v2668_v17 }
  0xe2   :  { %v137_v25 = vmax.f32 %v131_v21, 0.0  ;;  %v2630_v20 = vld [vmem:[%s3776_s5 + $0x10c] ss:$16 sps:$4 sm:$0xff]   ;;  %1466 = vmatpush1.bf16.msra.mxu1 %v2673_v19  ;;  %v2676_v21 = vld [vmem:[%s3776_s5 + $0x204] ss:$16 sps:$4 sm:$0xff]  }
  0xe3   :  { %v138_v27 = vmax.f32 %v133_v23, 0.0  ;;  %v2628_v22 = vld [vmem:[%s3776_s5 + $0x108] ss:$16 sps:$4 sm:$0xff]   ;;  %v2636_v23 = vld [vmem:[%s3776_s5 + $0x12c] ss:$16 sps:$4 sm:$0xff]   ;;  %1478 = vmatprep.subr.bf16.mxu1 %v2676_v21 }
  0xe4   :  { %v3139_v29 = vpack.c.bf16 %v137_v25, %v135_v24  ;;  %v2634_v24 = vld [vmem:[%s3776_s5 + $0x128] ss:$16 sps:$4 sm:$0xff]   ;;  %v2642_v25 = vld [vmem:[%s3776_s5 + $0x14c] ss:$16 sps:$4 sm:$0xff]  }
  0xe5   :  { %v140_v30 = vpack.c.bf16 %v138_v27, %v136_v26  ;;  %v2640_v26 = vld [vmem:[%s3776_s5 + $0x148] ss:$16 sps:$4 sm:$0xff]   ;;  %v2648_v27 = vld [vmem:[%s3776_s5 + $0x16c] ss:$16 sps:$4 sm:$0xff]  }
  0xe6   :  { %v2715_v17 = vld [vmem:[%s3776_s5 + $0x2cc] ss:$16 sps:$4 sm:$0xff]   ;;  %v2713_v19 = vld [vmem:[%s3776_s5 + $0x2c8] ss:$16 sps:$4 sm:$0xff]  }
  0xe7   :  { %579 = vmatprep.mubr.bf16.mxu0 %v140_v30  ;;  %v2721_v21 = vld [vmem:[%s3776_s5 + $0x2ec] ss:$16 sps:$4 sm:$0xff]  }
  0xe8   :  { %580 = vmatmul.mubr.bf16.vlgmr.msra.gmra.mrb[4].mxu0 %v3139_v29 }
  0xe9   :  { %591 = vmatpush1.bf16.msra.mxu0 %v2530_v28  ;;  %622 = vmatprep.mubr.bf16.mxu0 %v140_v30  ;;  %v2646_v28 = vld [vmem:[%s3776_s5 + $0x168] ss:$16 sps:$4 sm:$0xff]  }
  0xea   :  { %592 = vmatprep.subr.bf16.mxu0 %v2535_v31  ;;  %v2652_v30 = vld [vmem:[%s3776_s5 + $0x188] ss:$16 sps:$4 sm:$0xff]   ;;  %v2660_v31 = vld [vmem:[%s3776_s5 + $0x1ac] ss:$16 sps:$4 sm:$0xff]  }
  0xed   :  { %593 = vmatpush1.bf16.msra.mxu0 %v2533_v32  ;;  %v2658_v32 = vld [vmem:[%s3776_s5 + $0x1a8] ss:$16 sps:$4 sm:$0xff]  }
  0xee   :  { %594 = vmatprep.subr.bf16.mxu0 %v2538_v33  ;;  %v2666_v33 = vld [vmem:[%s3776_s5 + $0x1cc] ss:$16 sps:$4 sm:$0xff]  }
  0xf1   :  { %595 = vmatpush1.bf16.msra.mxu0 %v2536_v34  ;;  %v2664_v34 = vld [vmem:[%s3776_s5 + $0x1c8] ss:$16 sps:$4 sm:$0xff]  }
  0xf2   :  { %596 = vmatprep.subr.bf16.mxu0 %v2541_v35  ;;  %v2672_v35 = vld [vmem:[%s3776_s5 + $0x1ec] ss:$16 sps:$4 sm:$0xff]  }
  0xf5   :  { %597 = vmatpush1.bf16.msra.mxu0 %v2539_v36  ;;  %v2670_v36 = vld [vmem:[%s3776_s5 + $0x1e8] ss:$16 sps:$4 sm:$0xff]  }
  0xf6   :  { %598 = vmatprep.subr.bf16.mxu0 %v2544_v37  ;;  %v2679_v37 = vld [vmem:[%s3776_s5 + $0x20c] ss:$16 sps:$4 sm:$0xff]  }
  0xf9   :  { %599 = vmatpush1.bf16.msra.mxu0 %v2542_v38  ;;  %v3350_v38 = vld [vmem:[%s3779_s4] sm:$0xf] }
  0xfa   :  { %600 = vmatprep.subr.bf16.mxu0 %v2547_v39  ;;  %v210_v39 = vrot.slane %v3350_v38, %v3117_v8 }
  0xfd   :  { %601 = vmatpush1.bf16.msra.mxu0 %v2545_v40  ;;  %v214_v40 = vrot.slane %v3350_v38, %v3123_v10 }
  0xfe   :  { %602 = vmatprep.subr.bf16.mxu0 %v2550_v41 }
 0x101   :  { %603 = vmatpush1.bf16.msra.mxu0 %v2548_v42 }
 0x102   :  { %604 = vmatprep.subr.bf16.mxu0 %v2553_v43 }
 0x105   :  { %605 = vmatpush1.bf16.msra.mxu0 %v2551_v44 }
 0x106   :  { %606 = vmatprep.subr.bf16.mxu0 %v2556_v45 }
 0x109   :  { %607 = vmatpush1.bf16.msra.mxu0 %v2554_v46 }
 0x10a   :  { %608 = vmatprep.subr.bf16.mxu0 %v2559_v47 }
 0x10d   :  { %609 = vmatpush1.bf16.msra.mxu0 %v2557_v48 }
 0x10e   :  { %610 = vmatprep.subr.bf16.mxu0 %v2562_v49 }
 0x111   :  { %611 = vmatpush1.bf16.msra.mxu0 %v2560_v50 }
 0x112   :  { %612 = vmatprep.subr.bf16.mxu0 %v2565_v51 }
 0x115   :  { %613 = vmatpush1.bf16.msra.mxu0 %v2563_v52 }
 0x116   :  { %614 = vmatprep.subr.bf16.mxu0 %v2568_v53 }
 0x119   :  { %615 = vmatpush1.bf16.msra.mxu0 %v2566_v54 }
 0x11a   :  { %616 = vmatprep.subr.bf16.mxu0 %v2571_v55  ;;  %v2674_v55 = vld [vmem:[%s3776_s5 + $0x200] ss:$16 sps:$4 sm:$0xff]  }
 0x11d   :  { %617 = vmatpush1.bf16.msra.mxu0 %v2569_v56  ;;  %v2677_v56 = vld [vmem:[%s3776_s5 + $0x208] ss:$16 sps:$4 sm:$0xff]  }
 0x11e   :  { %618 = vmatprep.subr.bf16.mxu0 %v2574_v57  ;;  %v2682_v57 = vld [vmem:[%s3776_s5 + $0x224] ss:$16 sps:$4 sm:$0xff]  }
 0x121   :  { %619 = vmatpush1.bf16.msra.mxu0 %v2572_v58  ;;  %v2685_v58 = vld [vmem:[%s3776_s5 + $0x22c] ss:$16 sps:$4 sm:$0xff]  }
 0x122   :  { %620 = vmatprep.subr.bf16.mxu0 %v2577_v59  ;;  %v2680_v59 = vld [vmem:[%s3776_s5 + $0x220] ss:$16 sps:$4 sm:$0xff]  }
 0x125   :  { %621 = vmatpush1.bf16.msra.mxu0 %v2575_v60  ;;  %v2683_v60 = vld [vmem:[%s3776_s5 + $0x228] ss:$16 sps:$4 sm:$0xff]  }
 0x126   :  { %1521 = vmatprep.subr.bf16.mxu0 %v2582_v61  ;;  %v2688_v61 = vld [vmem:[%s3776_s5 + $0x244] ss:$16 sps:$4 sm:$0xff]  }
 0x128   :  { %623 = vmatmul.mubr.bf16.vlgmr.msra.gmra.mrb[8].mxu0 %v3139_v29  ;;  %v2654_v29 = vld [vmem:[%s3776_s5 + $0x18c] ss:$16 sps:$4 sm:$0xff]  }
 0x129   :  { %1522 = vmatpush1.bf16.msra.mxu0 %v2580_v62  ;;  %v2691_v62 = vld [vmem:[%s3776_s5 + $0x24c] ss:$16 sps:$4 sm:$0xff]  }
 0x12a   :  { %1523 = vmatprep.subr.bf16.mxu0 %v2588_v63  ;;  %v2686_v63 = vld [vmem:[%s3776_s5 + $0x240] ss:$16 sps:$4 sm:$0xff]  }
 0x12d   :  { %1524 = vmatpush1.bf16.msra.mxu0 %v2586_v0  ;;  %v2689_v0 = vld [vmem:[%s3776_s5 + $0x248] ss:$16 sps:$4 sm:$0xff]  }
 0x12e   :  { %1525 = vmatprep.subr.bf16.mxu0 %v2594_v1  ;;  %v2694_v1 = vld [vmem:[%s3776_s5 + $0x264] ss:$16 sps:$4 sm:$0xff]  }
 0x131   :  { %1526 = vmatpush1.bf16.msra.mxu0 %v2592_v2  ;;  %v2697_v2 = vld [vmem:[%s3776_s5 + $0x26c] ss:$16 sps:$4 sm:$0xff]  }
 0x132   :  { %1527 = vmatprep.subr.bf16.mxu0 %v2600_v3  ;;  %v2692_v3 = vld [vmem:[%s3776_s5 + $0x260] ss:$16 sps:$4 sm:$0xff]  }
 0x135   :  { %1528 = vmatpush1.bf16.msra.mxu0 %v2598_v5  ;;  %v2695_v5 = vld [vmem:[%s3776_s5 + $0x268] ss:$16 sps:$4 sm:$0xff]  }
 0x136   :  { %1529 = vmatprep.subr.bf16.mxu0 %v2606_v6  ;;  %v2700_v6 = vld [vmem:[%s3776_s5 + $0x284] ss:$16 sps:$4 sm:$0xff]  }
 0x139   :  { %1530 = vmatpush1.bf16.msra.mxu0 %v2604_v7  ;;  %v2703_v7 = vld [vmem:[%s3776_s5 + $0x28c] ss:$16 sps:$4 sm:$0xff]  }
 0x13a   :  { %1531 = vmatprep.subr.bf16.mxu0 %v2612_v9  ;;  %v2698_v9 = vld [vmem:[%s3776_s5 + $0x280] ss:$16 sps:$4 sm:$0xff]  }
 0x13d   :  { %1532 = vmatpush1.bf16.msra.mxu0 %v2610_v11  ;;  %v2701_v11 = vld [vmem:[%s3776_s5 + $0x288] ss:$16 sps:$4 sm:$0xff]  }
 0x13e   :  { %1533 = vmatprep.subr.bf16.mxu0 %v2618_v12  ;;  %v2706_v12 = vld [vmem:[%s3776_s5 + $0x2a4] ss:$16 sps:$4 sm:$0xff]  }
 0x141   :  { %1534 = vmatpush1.bf16.msra.mxu0 %v2616_v14  ;;  %v2704_v14 = vld [vmem:[%s3776_s5 + $0x2a0] ss:$16 sps:$4 sm:$0xff]  }
 0x142   :  { %1535 = vmatprep.subr.bf16.mxu0 %v2624_v16  ;;  %v2712_v16 = vld [vmem:[%s3776_s5 + $0x2c4] ss:$16 sps:$4 sm:$0xff]  }
 0x145   :  { %1536 = vmatpush1.bf16.msra.mxu0 %v2622_v18  ;;  %v2710_v18 = vld [vmem:[%s3776_s5 + $0x2c0] ss:$16 sps:$4 sm:$0xff]  }
 0x146   :  { %1537 = vmatprep.subr.bf16.mxu0 %v2630_v20  ;;  %v2718_v20 = vld [vmem:[%s3776_s5 + $0x2e4] ss:$16 sps:$4 sm:$0xff]  }
 0x149   :  { %1538 = vmatpush1.bf16.msra.mxu0 %v2628_v22  ;;  %v2716_v22 = vld [vmem:[%s3776_s5 + $0x2e0] ss:$16 sps:$4 sm:$0xff]  }
 0x14a   :  { %1539 = vmatprep.subr.bf16.mxu0 %v2636_v23  ;;  %v2719_v23 = vld [vmem:[%s3776_s5 + $0x2e8] ss:$16 sps:$4 sm:$0xff]  }
 0x14d   :  { %1540 = vmatpush1.bf16.msra.mxu0 %v2634_v24  ;;  %v2724_v24 = vld [vmem:[%s3776_s5 + $0x304] ss:$16 sps:$4 sm:$0xff]  }
 0x14e   :  { %1541 = vmatprep.subr.bf16.mxu0 %v2642_v25  ;;  %v2727_v25 = vld [vmem:[%s3776_s5 + $0x30c] ss:$16 sps:$4 sm:$0xff]  }
 0x151   :  { %1542 = vmatpush1.bf16.msra.mxu0 %v2640_v26  ;;  %v2722_v26 = vld [vmem:[%s3776_s5 + $0x300] ss:$16 sps:$4 sm:$0xff]  }
 0x152   :  { %1543 = vmatprep.subr.bf16.mxu0 %v2648_v27  ;;  %v2725_v27 = vld [vmem:[%s3776_s5 + $0x308] ss:$16 sps:$4 sm:$0xff]  }
 0x155   :  { %1544 = vmatpush1.bf16.msra.mxu0 %v2646_v28  ;;  %v2730_v28 = vld [vmem:[%s3776_s5 + $0x324] ss:$16 sps:$4 sm:$0xff]  }
 0x156   :  { %1545 = vmatprep.subr.bf16.mxu0 %v2654_v29  ;;  %v2733_v29 = vld [vmem:[%s3776_s5 + $0x32c] ss:$16 sps:$4 sm:$0xff]  }
 0x159   :  { %1546 = vmatpush1.bf16.msra.mxu0 %v2652_v30  ;;  %v2728_v30 = vld [vmem:[%s3776_s5 + $0x320] ss:$16 sps:$4 sm:$0xff]  }
 0x15a   :  { %1547 = vmatprep.subr.bf16.mxu0 %v2660_v31  ;;  %v2731_v31 = vld [vmem:[%s3776_s5 + $0x328] ss:$16 sps:$4 sm:$0xff]  }
 0x15d   :  { %1548 = vmatpush1.bf16.msra.mxu0 %v2658_v32  ;;  %v2736_v32 = vld [vmem:[%s3776_s5 + $0x344] ss:$16 sps:$4 sm:$0xff]  }
 0x15e   :  { %1549 = vmatprep.subr.bf16.mxu0 %v2666_v33  ;;  %v2739_v33 = vld [vmem:[%s3776_s5 + $0x34c] ss:$16 sps:$4 sm:$0xff]  }
 0x161   :  { %1550 = vmatpush1.bf16.msra.mxu0 %v2664_v34  ;;  %v2734_v34 = vld [vmem:[%s3776_s5 + $0x340] ss:$16 sps:$4 sm:$0xff]  }
 0x162   :  { %1551 = vmatprep.subr.bf16.mxu0 %v2672_v35  ;;  %v2737_v35 = vld [vmem:[%s3776_s5 + $0x348] ss:$16 sps:$4 sm:$0xff]  }
 0x165   :  { %1552 = vmatpush1.bf16.msra.mxu0 %v2670_v36  ;;  %v2742_v36 = vld [vmem:[%s3776_s5 + $0x364] ss:$16 sps:$4 sm:$0xff]  }
 0x166   :  { %1564 = vmatprep.subr.bf16.mxu0 %v2679_v37  ;;  %v2745_v37 = vld [vmem:[%s3776_s5 + $0x36c] ss:$16 sps:$4 sm:$0xff]  }
 0x1bb   :  { %v581_v41 = vpop.f32.mrb[4].mxu0 }
 0x1bc   :  { %v582_v42 = vadd.f32 %v581_v41, %v210_v39  ;;  %v583_v43 = vpop.f32.mrb[5].mxu0  ;;  %v2748_v41 = vld [vmem:[%s3776_s5 + $0x384] ss:$16 sps:$4 sm:$0xff]  }
 0x1bd   :  { %v584_v44 = vadd.f32 %v583_v43, %v214_v40  ;;  %v585_v45 = vpop.f32.mrb[6].mxu0  ;;  %v2746_v43 = vld [vmem:[%s3776_s5 + $0x380] ss:$16 sps:$4 sm:$0xff]  }
 0x1be   :  { %v586_v46 = vadd.f32 %v585_v45, %v210_v39  ;;  %v587_v47 = vpop.f32.mrb[7].mxu0  ;;  %v633_v49 = vmax.f32 %v582_v42, 0.0  ;;  %v2740_v39 = vld [vmem:[%s3776_s5 + $0x360] ss:$16 sps:$4 sm:$0xff]   ;;  %v2751_v42 = vld [vmem:[%s3776_s5 + $0x38c] ss:$16 sps:$4 sm:$0xff]  }
 0x1bf   :  { %v588_v48 = vadd.f32 %v587_v47, %v214_v40  ;;  %v634_v51 = vmax.f32 %v584_v44, 0.0  ;;  %v2743_v40 = vld [vmem:[%s3776_s5 + $0x368] ss:$16 sps:$4 sm:$0xff]   ;;  %v2754_v45 = vld [vmem:[%s3776_s5 + $0x3a4] ss:$16 sps:$4 sm:$0xff]   ;;  %v3513_v47 = vsub.s32 2, %v3105_v4 }
 0x1c0   :  { %v637_v50 = vmax.f32 %v586_v46, 0.0  ;;  %v2749_v44 = vld [vmem:[%s3776_s5 + $0x388] ss:$16 sps:$4 sm:$0xff]   ;;  %v2757_v46 = vld [vmem:[%s3776_s5 + $0x3ac] ss:$16 sps:$4 sm:$0xff]  }
 0x1c1   :  { %v638_v52 = vmax.f32 %v588_v48, 0.0  ;;  %v221_v48 = vsub.s32 3, %v3105_v4 }
 0x1c2   :  { %v641_v53 = vpack.c.bf16 %v637_v50, %v633_v49  ;;  %v2752_v49 = vld [vmem:[%s3776_s5 + $0x3a0] ss:$16 sps:$4 sm:$0xff]   ;;  %v2755_v50 = vld [vmem:[%s3776_s5 + $0x3a8] ss:$16 sps:$4 sm:$0xff]  }
 0x1c3   :  { %v642_v54 = vpack.c.bf16 %v638_v52, %v634_v51  ;;  %v218_v51 = vrot.slane %v3350_v38, %v3513_v47  ;;  %v2760_v52 = vld [vmem:[%s3776_s5 + $0x3c4] ss:$16 sps:$4 sm:$0xff]  }
 0x1c5   :  { %1467 = vmatprep.mubr.bf16.mxu1 %v642_v54  ;;  %1553 = vmatprep.mubr.bf16.mxu0 %v642_v54  ;;  %v222_v54 = vrot.slane %v3350_v38, %v221_v48  ;;  %v2769_v38 = vld [vmem:[%s3776_s5 + $0x3ec] ss:$16 sps:$4 sm:$0xff]  }
 0x1c6   :  { %1468 = vmatmul.mubr.bf16.vlgmr.msra.gmra.mrb[0].mxu1 %v641_v53  ;;  %1554 = vmatmul.mubr.bf16.vlgmr.msra.gmra.mrb[12].mxu0 %v641_v53  ;;  %v2763_v53 = vld [vmem:[%s3776_s5 + $0x3cc] ss:$16 sps:$4 sm:$0xff]  }
 0x1c7   :  { %1479 = vmatpush1.bf16.msra.mxu1 %v2674_v55  ;;  %1565 = vmatpush1.bf16.msra.mxu0 %v2677_v56  ;;  %v2758_v56 = vld [vmem:[%s3776_s5 + $0x3c0] ss:$16 sps:$4 sm:$0xff]  }
 0x1c8   :  { %1480 = vmatprep.subr.bf16.mxu1 %v2682_v57  ;;  %1566 = vmatprep.subr.bf16.mxu0 %v2685_v58  ;;  %v2761_v57 = vld [vmem:[%s3776_s5 + $0x3c8] ss:$16 sps:$4 sm:$0xff]  }
 0x1cb   :  { %1481 = vmatpush1.bf16.msra.mxu1 %v2680_v59  ;;  %1567 = vmatpush1.bf16.msra.mxu0 %v2683_v60  ;;  %v2766_v60 = vld [vmem:[%s3776_s5 + $0x3e4] ss:$16 sps:$4 sm:$0xff]  }
 0x1cc   :  { %1482 = vmatprep.subr.bf16.mxu1 %v2688_v61  ;;  %1568 = vmatprep.subr.bf16.mxu0 %v2691_v62 }
 0x1cf   :  { %1483 = vmatpush1.bf16.msra.mxu1 %v2686_v63  ;;  %1569 = vmatpush1.bf16.msra.mxu0 %v2689_v0 }
 0x1d0   :  { %1484 = vmatprep.subr.bf16.mxu1 %v2694_v1  ;;  %1570 = vmatprep.subr.bf16.mxu0 %v2697_v2  ;;  %v2764_v2 = vld [vmem:[%s3776_s5 + $0x3e0] ss:$16 sps:$4 sm:$0xff]  }
 0x1d3   :  { %1485 = vmatpush1.bf16.msra.mxu1 %v2692_v3  ;;  %1571 = vmatpush1.bf16.msra.mxu0 %v2695_v5  ;;  %v2767_v3 = vld [vmem:[%s3776_s5 + $0x3e8] ss:$16 sps:$4 sm:$0xff]  }
 0x1d4   :  { %1486 = vmatprep.subr.bf16.mxu1 %v2700_v6  ;;  %1572 = vmatprep.subr.bf16.mxu0 %v2703_v7  ;;  %v2772_v7 = vld [vmem:[%s3778_s7 + $0x4] ss:$8 sps:$4 sm:$0xff]  }
 0x1d7   :  { %1487 = vmatpush1.bf16.msra.mxu1 %v2698_v9  ;;  %1573 = vmatpush1.bf16.msra.mxu0 %v2701_v11 }
 0x1d8   :  { %1488 = vmatprep.subr.bf16.mxu1 %v2706_v12  ;;  %1574 = vmatprep.subr.bf16.mxu0 %v2709_v13 }
 0x1db   :  { %1489 = vmatpush1.bf16.msra.mxu1 %v2704_v14  ;;  %1575 = vmatpush1.bf16.msra.mxu0 %v2707_v15  ;;  %v2770_v14 = vld [vmem:[%s3778_s7] ss:$8 sps:$4 sm:$0xff]   ;;  %v2775_v15 = vld [vmem:[%s3778_s7 + $0x14] ss:$8 sps:$4 sm:$0xff]  }
 0x1dc   :  { %1490 = vmatprep.subr.bf16.mxu1 %v2712_v16  ;;  %1576 = vmatprep.subr.bf16.mxu0 %v2715_v17  ;;  %v2773_v16 = vld [vmem:[%s3778_s7 + $0x10] ss:$8 sps:$4 sm:$0xff]   ;;  %v2778_v17 = vld [vmem:[%s3778_s7 + $0x24] ss:$8 sps:$4 sm:$0xff]  }
 0x1df   :  { %1491 = vmatpush1.bf16.msra.mxu1 %v2710_v18  ;;  %1577 = vmatpush1.bf16.msra.mxu0 %v2713_v19  ;;  %v2776_v18 = vld [vmem:[%s3778_s7 + $0x20] ss:$8 sps:$4 sm:$0xff]   ;;  %v2781_v19 = vld [vmem:[%s3778_s7 + $0x34] ss:$8 sps:$4 sm:$0xff]  }
 0x1e0   :  { %1492 = vmatprep.subr.bf16.mxu1 %v2718_v20  ;;  %1578 = vmatprep.subr.bf16.mxu0 %v2721_v21  ;;  %v2779_v20 = vld [vmem:[%s3778_s7 + $0x30] ss:$8 sps:$4 sm:$0xff]   ;;  %v2784_v21 = vld [vmem:[%s3778_s7 + $0x44] ss:$8 sps:$4 sm:$0xff]  }
 0x1e3   :  { %1493 = vmatpush1.bf16.msra.mxu1 %v2716_v22  ;;  %1579 = vmatpush1.bf16.msra.mxu0 %v2719_v23  ;;  %v2782_v22 = vld [vmem:[%s3778_s7 + $0x40] ss:$8 sps:$4 sm:$0xff]   ;;  %v2787_v23 = vld [vmem:[%s3778_s7 + $0x54] ss:$8 sps:$4 sm:$0xff]  }
 0x1e4   :  { %1494 = vmatprep.subr.bf16.mxu1 %v2724_v24  ;;  %1580 = vmatprep.subr.bf16.mxu0 %v2727_v25  ;;  %v2785_v24 = vld [vmem:[%s3778_s7 + $0x50] ss:$8 sps:$4 sm:$0xff]   ;;  %v2790_v25 = vld [vmem:[%s3778_s7 + $0x64] ss:$8 sps:$4 sm:$0xff]  }
 0x1e7   :  { %1495 = vmatpush1.bf16.msra.mxu1 %v2722_v26  ;;  %1581 = vmatpush1.bf16.msra.mxu0 %v2725_v27  ;;  %v2788_v26 = vld [vmem:[%s3778_s7 + $0x60] ss:$8 sps:$4 sm:$0xff]   ;;  %v2793_v27 = vld [vmem:[%s3778_s7 + $0x74] ss:$8 sps:$4 sm:$0xff]  }
 0x1e8   :  { %1496 = vmatprep.subr.bf16.mxu1 %v2730_v28  ;;  %1582 = vmatprep.subr.bf16.mxu0 %v2733_v29  ;;  %v2791_v28 = vld [vmem:[%s3778_s7 + $0x70] ss:$8 sps:$4 sm:$0xff]   ;;  %v2796_v29 = vld [vmem:[%s3778_s7 + $0x84] ss:$8 sps:$4 sm:$0xff]  }
 0x1eb   :  { %1497 = vmatpush1.bf16.msra.mxu1 %v2728_v30  ;;  %1583 = vmatpush1.bf16.msra.mxu0 %v2731_v31  ;;  %v2794_v30 = vld [vmem:[%s3778_s7 + $0x80] ss:$8 sps:$4 sm:$0xff]   ;;  %v2799_v31 = vld [vmem:[%s3778_s7 + $0x94] ss:$8 sps:$4 sm:$0xff]  }
 0x1ec   :  { %1498 = vmatprep.subr.bf16.mxu1 %v2736_v32  ;;  %1584 = vmatprep.subr.bf16.mxu0 %v2739_v33  ;;  %v2797_v32 = vld [vmem:[%s3778_s7 + $0x90] ss:$8 sps:$4 sm:$0xff]   ;;  %v2802_v33 = vld [vmem:[%s3778_s7 + $0xa4] ss:$8 sps:$4 sm:$0xff]  }
 0x1ef   :  { %1499 = vmatpush1.bf16.msra.mxu1 %v2734_v34  ;;  %1585 = vmatpush1.bf16.msra.mxu0 %v2737_v35  ;;  %v2800_v34 = vld [vmem:[%s3778_s7 + $0xa0] ss:$8 sps:$4 sm:$0xff]   ;;  %v2805_v35 = vld [vmem:[%s3778_s7 + $0xb4] ss:$8 sps:$4 sm:$0xff]  }
 0x1f0   :  { %1500 = vmatprep.subr.bf16.mxu1 %v2742_v36  ;;  %1586 = vmatprep.subr.bf16.mxu0 %v2745_v37  ;;  %v2803_v36 = vld [vmem:[%s3778_s7 + $0xb0] ss:$8 sps:$4 sm:$0xff]   ;;  %v2808_v37 = vld [vmem:[%s3778_s7 + $0xc4] ss:$8 sps:$4 sm:$0xff]  }
 0x1f3   :  { %1501 = vmatpush1.bf16.msra.mxu1 %v2740_v39  ;;  %1587 = vmatpush1.bf16.msra.mxu0 %v2743_v40  ;;  %v2806_v39 = vld [vmem:[%s3778_s7 + $0xc0] ss:$8 sps:$4 sm:$0xff]   ;;  %v2811_v40 = vld [vmem:[%s3778_s7 + $0xd4] ss:$8 sps:$4 sm:$0xff]  }
 0x1f4   :  { %1502 = vmatprep.subr.bf16.mxu1 %v2748_v41  ;;  %1588 = vmatprep.subr.bf16.mxu0 %v2751_v42  ;;  %v2809_v41 = vld [vmem:[%s3778_s7 + $0xd0] ss:$8 sps:$4 sm:$0xff]   ;;  %v2814_v42 = vld [vmem:[%s3778_s7 + $0xe4] ss:$8 sps:$4 sm:$0xff]  }
 0x1f7   :  { %1503 = vmatpush1.bf16.msra.mxu1 %v2746_v43  ;;  %1589 = vmatpush1.bf16.msra.mxu0 %v2749_v44  ;;  %v2812_v43 = vld [vmem:[%s3778_s7 + $0xe0] ss:$8 sps:$4 sm:$0xff]   ;;  %v2817_v44 = vld [vmem:[%s3778_s7 + $0xf4] ss:$8 sps:$4 sm:$0xff]  }
 0x1f8   :  { %1504 = vmatprep.subr.bf16.mxu1 %v2754_v45  ;;  %1590 = vmatprep.subr.bf16.mxu0 %v2757_v46  ;;  %v2815_v45 = vld [vmem:[%s3778_s7 + $0xf0] ss:$8 sps:$4 sm:$0xff]   ;;  %v2820_v46 = vld [vmem:[%s3778_s7 + $0x104] ss:$8 sps:$4 sm:$0xff]  }
 0x1fb   :  { %v624_v55 = vpop.f32.mrb[8].mxu0  ;;  %1505 = vmatpush1.bf16.msra.mxu1 %v2752_v49  ;;  %1591 = vmatpush1.bf16.msra.mxu0 %v2755_v50  ;;  %v773_v49 = vld [vmem:[%s3780_s6] sm:$0xf] }
 0x1fc   :  { %v625_v58 = vadd.f32 %v624_v55, %v218_v51  ;;  %v626_v59 = vpop.f32.mrb[9].mxu0  ;;  %1506 = vmatprep.subr.bf16.mxu1 %v2760_v52  ;;  %1592 = vmatprep.subr.bf16.mxu0 %v2763_v53  ;;  %v778_v50 = vrot.slane %v773_v49, %v3117_v8  ;;  %v782_v52 = vrot.slane %v773_v49, %v3123_v10 }
 0x1fd   :  { %v627_v61 = vadd.f32 %v626_v59, %v222_v54  ;;  %v628_v62 = vpop.f32.mrb[10].mxu0  ;;  %v790_v53 = vrot.slane %v773_v49, %v221_v48 }
 0x1fe   :  { %v629_v63 = vadd.f32 %v628_v62, %v218_v51  ;;  %v630_v0 = vpop.f32.mrb[11].mxu0  ;;  %v635_v5 = vmax.f32 %v625_v58, 0.0  ;;  %v786_v51 = vrot.slane %v773_v49, %v3513_v47  ;;  %v2860_v49 = vld [vmem:[%s3778_s7 + $0x1e0] ss:$8 sps:$4 sm:$0xff]  }
 0x1ff   :  { %v631_v1 = vadd.f32 %v630_v0, %v222_v54  ;;  %1507 = vmatpush1.bf16.msra.mxu1 %v2758_v56  ;;  %1593 = vmatpush1.bf16.msra.mxu0 %v2761_v57  ;;  %v636_v9 = vmax.f32 %v627_v61, 0.0 }
 0x200   :  { %v639_v6 = vmax.f32 %v629_v63, 0.0  ;;  %1508 = vmatprep.subr.bf16.mxu1 %v2766_v60  ;;  %1594 = vmatprep.subr.bf16.mxu0 %v2769_v38 }
 0x201   :  { %v640_v11 = vmax.f32 %v631_v1, 0.0 }
 0x202   :  { %v643_v12 = vpack.c.bf16 %v639_v6, %v635_v5 }
 0x203   :  { %v644_v13 = vpack.c.bf16 %v640_v11, %v636_v9  ;;  %1509 = vmatpush1.bf16.msra.mxu1 %v2764_v2  ;;  %1595 = vmatpush1.bf16.msra.mxu0 %v2767_v3 }
 0x204   :  { %2015 = vmatprep.subr.bf16.mxu1 %v2772_v7 }
 0x205   :  { %1510 = vmatprep.mubr.bf16.mxu1 %v644_v13  ;;  %1596 = vmatprep.mubr.bf16.mxu0 %v644_v13 }
 0x206   :  { %1511 = vmatmul.mubr.bf16.vlgmr.msra.gmra.mrb[0].mxu1 %v643_v12  ;;  %1597 = vmatmul.mubr.bf16.vlgmr.msra.gmra.mrb[12].mxu0 %v643_v12 }
 0x207   :  { %2016 = vmatpush1.bf16.msra.mxu1 %v2770_v14 }
 0x208   :  { %2017 = vmatprep.subr.bf16.mxu1 %v2775_v15 }
 0x20b   :  { %2018 = vmatpush1.bf16.msra.mxu1 %v2773_v16 }
 0x20c   :  { %2019 = vmatprep.subr.bf16.mxu1 %v2778_v17 }
 0x20f   :  { %2020 = vmatpush1.bf16.msra.mxu1 %v2776_v18  ;;  %v2818_v18 = vld [vmem:[%s3778_s7 + $0x100] ss:$8 sps:$4 sm:$0xff]  }
 0x210   :  { %2021 = vmatprep.subr.bf16.mxu1 %v2781_v19  ;;  %v2823_v19 = vld [vmem:[%s3778_s7 + $0x114] ss:$8 sps:$4 sm:$0xff]  }
 0x213   :  { %2022 = vmatpush1.bf16.msra.mxu1 %v2779_v20  ;;  %v2821_v20 = vld [vmem:[%s3778_s7 + $0x110] ss:$8 sps:$4 sm:$0xff]  }
 0x214   :  { %2023 = vmatprep.subr.bf16.mxu1 %v2784_v21  ;;  %v2826_v21 = vld [vmem:[%s3778_s7 + $0x124] ss:$8 sps:$4 sm:$0xff]  }
 0x217   :  { %2024 = vmatpush1.bf16.msra.mxu1 %v2782_v22  ;;  %v2824_v22 = vld [vmem:[%s3778_s7 + $0x120] ss:$8 sps:$4 sm:$0xff]  }
 0x218   :  { %2025 = vmatprep.subr.bf16.mxu1 %v2787_v23  ;;  %v2829_v23 = vld [vmem:[%s3778_s7 + $0x134] ss:$8 sps:$4 sm:$0xff]  }
 0x21b   :  { %2026 = vmatpush1.bf16.msra.mxu1 %v2785_v24  ;;  %v2827_v24 = vld [vmem:[%s3778_s7 + $0x130] ss:$8 sps:$4 sm:$0xff]  }
 0x21c   :  { %2027 = vmatprep.subr.bf16.mxu1 %v2790_v25  ;;  %v2832_v25 = vld [vmem:[%s3778_s7 + $0x144] ss:$8 sps:$4 sm:$0xff]  }
 0x21f   :  { %2028 = vmatpush1.bf16.msra.mxu1 %v2788_v26  ;;  %v2830_v26 = vld [vmem:[%s3778_s7 + $0x140] ss:$8 sps:$4 sm:$0xff]  }
 0x220   :  { %2029 = vmatprep.subr.bf16.mxu1 %v2793_v27  ;;  %v2835_v27 = vld [vmem:[%s3778_s7 + $0x154] ss:$8 sps:$4 sm:$0xff]  }
 0x223   :  { %2030 = vmatpush1.bf16.msra.mxu1 %v2791_v28  ;;  %v2833_v28 = vld [vmem:[%s3778_s7 + $0x150] ss:$8 sps:$4 sm:$0xff]  }
 0x224   :  { %2031 = vmatprep.subr.bf16.mxu1 %v2796_v29  ;;  %v2838_v29 = vld [vmem:[%s3778_s7 + $0x164] ss:$8 sps:$4 sm:$0xff]  }
 0x227   :  { %2032 = vmatpush1.bf16.msra.mxu1 %v2794_v30  ;;  %v2836_v30 = vld [vmem:[%s3778_s7 + $0x160] ss:$8 sps:$4 sm:$0xff]  }
 0x228   :  { %2033 = vmatprep.subr.bf16.mxu1 %v2799_v31  ;;  %v2841_v31 = vld [vmem:[%s3778_s7 + $0x174] ss:$8 sps:$4 sm:$0xff]  }
 0x22b   :  { %2034 = vmatpush1.bf16.msra.mxu1 %v2797_v32  ;;  %v2839_v32 = vld [vmem:[%s3778_s7 + $0x170] ss:$8 sps:$4 sm:$0xff]  }
 0x22c   :  { %2035 = vmatprep.subr.bf16.mxu1 %v2802_v33  ;;  %v2844_v33 = vld [vmem:[%s3778_s7 + $0x184] ss:$8 sps:$4 sm:$0xff]  }
 0x22f   :  { %2036 = vmatpush1.bf16.msra.mxu1 %v2800_v34  ;;  %v2842_v34 = vld [vmem:[%s3778_s7 + $0x180] ss:$8 sps:$4 sm:$0xff]  }
 0x230   :  { %2037 = vmatprep.subr.bf16.mxu1 %v2805_v35  ;;  %v2847_v35 = vld [vmem:[%s3778_s7 + $0x194] ss:$8 sps:$4 sm:$0xff]  }
 0x233   :  { %2038 = vmatpush1.bf16.msra.mxu1 %v2803_v36  ;;  %v2845_v36 = vld [vmem:[%s3778_s7 + $0x190] ss:$8 sps:$4 sm:$0xff]  }
 0x234   :  { %2039 = vmatprep.subr.bf16.mxu1 %v2808_v37  ;;  %v2850_v37 = vld [vmem:[%s3778_s7 + $0x1a4] ss:$8 sps:$4 sm:$0xff]  }
 0x237   :  { %2040 = vmatpush1.bf16.msra.mxu1 %v2806_v39  ;;  %v2848_v39 = vld [vmem:[%s3778_s7 + $0x1a0] ss:$8 sps:$4 sm:$0xff]  }
 0x238   :  { %2041 = vmatprep.subr.bf16.mxu1 %v2811_v40  ;;  %v2853_v40 = vld [vmem:[%s3778_s7 + $0x1b4] ss:$8 sps:$4 sm:$0xff]  }
 0x23b   :  { %2042 = vmatpush1.bf16.msra.mxu1 %v2809_v41  ;;  %v2851_v41 = vld [vmem:[%s3778_s7 + $0x1b0] ss:$8 sps:$4 sm:$0xff]  }
 0x23c   :  { %2043 = vmatprep.subr.bf16.mxu1 %v2814_v42  ;;  %v2856_v42 = vld [vmem:[%s3778_s7 + $0x1c4] ss:$8 sps:$4 sm:$0xff]  }
 0x23f   :  { %2044 = vmatpush1.bf16.msra.mxu1 %v2812_v43  ;;  %v2854_v43 = vld [vmem:[%s3778_s7 + $0x1c0] ss:$8 sps:$4 sm:$0xff]  }
 0x240   :  { %2045 = vmatprep.subr.bf16.mxu1 %v2817_v44  ;;  %v2859_v44 = vld [vmem:[%s3778_s7 + $0x1d4] ss:$8 sps:$4 sm:$0xff]  }
 0x243   :  { %2046 = vmatpush1.bf16.msra.mxu1 %v2815_v45  ;;  %v2857_v45 = vld [vmem:[%s3778_s7 + $0x1d0] ss:$8 sps:$4 sm:$0xff]  }
 0x244   :  { %2058 = vmatprep.subr.bf16.mxu1 %v2820_v46  ;;  %v2862_v46 = vld [vmem:[%s3778_s7 + $0x1e4] ss:$8 sps:$4 sm:$0xff]  }
 0x2d9   :  { %v1512_v54 = vpop.f32.mrb[0].mxu1  ;;  %v1598_v55 = vpop.f32.mrb[12].mxu0 }
 0x2da   :  { %v2447_v56 = vadd.f32 %v1512_v54, %v778_v50  ;;  %v2451_v57 = vadd.f32 %v1598_v55, %v786_v51  ;;  %v1514_v58 = vpop.f32.mrb[1].mxu1  ;;  %v1600_v59 = vpop.f32.mrb[13].mxu0  ;;  %v2105_v54 = vld [vmem:[%s3782_s9] sm:$0x3] }
 0x2db   :  { %v2448_v60 = vadd.f32 %v1514_v58, %v782_v52  ;;  %v2452_v38 = vadd.f32 %v1600_v59, %v790_v53  ;;  %v1516_v61 = vpop.f32.mrb[2].mxu1  ;;  %v1602_v62 = vpop.f32.mrb[14].mxu0  ;;  %v2106_v55 = vunpack.c.l.bf16 %v2105_v54 }
 0x2dc   :  { %v2449_v63 = vadd.f32 %v1516_v61, %v778_v50  ;;  %v2453_v0 = vadd.f32 %v1602_v62, %v786_v51  ;;  %v1518_v1 = vpop.f32.mrb[3].mxu1  ;;  %v1604_v2 = vpop.f32.mrb[15].mxu0  ;;  %v1607_v6 = vmax.f32 %v2447_v56, 0.0  ;;  %v1609_v7 = vmax.f32 %v2451_v57, 0.0  ;;  %v2865_v50 = vld [vmem:[%s3778_s7 + $0x1f4] ss:$8 sps:$4 sm:$0xff]  }
 0x2dd   :  { %v2450_v3 = vadd.f32 %v1518_v1, %v782_v52  ;;  %v2454_v5 = vadd.f32 %v1604_v2, %v790_v53  ;;  %v1608_v9 = vmax.f32 %v2448_v60, 0.0  ;;  %v1610_v11 = vmax.f32 %v2452_v38, 0.0  ;;  %v2863_v51 = vld [vmem:[%s3778_s7 + $0x1f0] ss:$8 sps:$4 sm:$0xff]   ;;  %v1683_v56 = vld [vmem:[%s3783_s8] sm:$0x3] }
 0x2de   :  { %v1611_v4 = vmax.f32 %v2449_v63, 0.0  ;;  %v1613_v48 = vmax.f32 %v2453_v0, 0.0  ;;  %v16_v52 = vstv %s3781_s10  ;;  %v1688_v57 = vrot.slane %v1683_v56, %v3117_v8 }
 0x2df   :  { %v1612_v12 = vmax.f32 %v2450_v3, 0.0  ;;  %v1614_v13 = vmax.f32 %v2454_v5, 0.0  ;;  %17 = vst [vmem:[#allocation2] sm:$0x1] %v16_v52  ;;  %v2111_v58 = vrot.slane %v2106_v55, %v3117_v8  ;;  %v1692_v59 = vrot.slane %v1683_v56, %v3123_v10 }
 0x2e0   :  { %v1615_v14 = vpack.c.bf16 %v1611_v4, %v1607_v6  ;;  %v3658_v15 = vpack.c.bf16 %v1613_v48, %v1609_v7  ;;  %v2115_v60 = vrot.slane %v2106_v55, %v3513_v47 }
 0x2e1   :  { %v1616_v16 = vpack.c.bf16 %v1612_v12, %v1608_v9  ;;  %v1618_v17 = vpack.c.bf16 %v1614_v13, %v1610_v11  ;;  %v2121_v63 = vrot.slane %v2111_v58, %v3117_v8 }
 0x2e2   :  { %v2125_v2 = vrot.slane %v2115_v60, %v3117_v8 }
 0x2e3   :  { %2047 = vmatprep.mubr.bf16.mxu1 %v1616_v16 }
 0x2e4   :  { %2048 = vmatmul.mubr.bf16.vlgmr.msra.gmra.mrb[4].mxu1 %v1615_v14 }
 0x2e5   :  { %2059 = vmatpush1.bf16.msra.mxu1 %v2818_v18  ;;  %2090 = vmatprep.mubr.bf16.mxu1 %v1618_v17 }
 0x2e6   :  { %2060 = vmatprep.subr.bf16.mxu1 %v2823_v19  ;;  %v2168_v53 = vld [vmem:[#allocation2] sm:$0x1] }
 0x2e7   :  { %2171 = vperm.xlu1 %2474, %v2168_v53  }
 0x2e9   :  { %2061 = vmatpush1.bf16.msra.mxu1 %v2821_v20 }
 0x2ea   :  { %2062 = vmatprep.subr.bf16.mxu1 %v2826_v21 }
 0x2ed   :  { %2063 = vmatpush1.bf16.msra.mxu1 %v2824_v22 }
 0x2ee   :  { %2064 = vmatprep.subr.bf16.mxu1 %v2829_v23 }
 0x2f1   :  { %2065 = vmatpush1.bf16.msra.mxu1 %v2827_v24 }
 0x2f2   :  { %2066 = vmatprep.subr.bf16.mxu1 %v2832_v25 }
 0x2f5   :  { %2067 = vmatpush1.bf16.msra.mxu1 %v2830_v26 }
 0x2f6   :  { %2068 = vmatprep.subr.bf16.mxu1 %v2835_v27 }
 0x2f9   :  { %2069 = vmatpush1.bf16.msra.mxu1 %v2833_v28 }
 0x2fa   :  { %2070 = vmatprep.subr.bf16.mxu1 %v2838_v29 }
 0x2fd   :  { %2071 = vmatpush1.bf16.msra.mxu1 %v2836_v30 }
 0x2fe   :  { %2072 = vmatprep.subr.bf16.mxu1 %v2841_v31 }
 0x301   :  { %2073 = vmatpush1.bf16.msra.mxu1 %v2839_v32 }
 0x302   :  { %2074 = vmatprep.subr.bf16.mxu1 %v2844_v33 }
 0x305   :  { %2075 = vmatpush1.bf16.msra.mxu1 %v2842_v34 }
 0x306   :  { %2076 = vmatprep.subr.bf16.mxu1 %v2847_v35 }
 0x309   :  { %2077 = vmatpush1.bf16.msra.mxu1 %v2845_v36 }
 0x30a   :  { %2078 = vmatprep.subr.bf16.mxu1 %v2850_v37 }
 0x30d   :  { %2079 = vmatpush1.bf16.msra.mxu1 %v2848_v39 }
 0x30e   :  { %2080 = vmatprep.subr.bf16.mxu1 %v2853_v40 }
 0x311   :  { %2081 = vmatpush1.bf16.msra.mxu1 %v2851_v41 }
 0x312   :  { %2082 = vmatprep.subr.bf16.mxu1 %v2856_v42 }
 0x315   :  { %2083 = vmatpush1.bf16.msra.mxu1 %v2854_v43 }
 0x316   :  { %2084 = vmatprep.subr.bf16.mxu1 %v2859_v44 }
 0x319   :  { %2085 = vmatpush1.bf16.msra.mxu1 %v2857_v45 }
 0x31a   :  { %2086 = vmatprep.subr.bf16.mxu1 %v2862_v46 }
 0x31d   :  { %2087 = vmatpush1.bf16.msra.mxu1 %v2860_v49 }
 0x31e   :  { %2088 = vmatprep.subr.bf16.mxu1 %v2865_v50 }
 0x321   :  { %2089 = vmatpush1.bf16.msra.mxu1 %v2863_v51 }
 0x324   :  { %2091 = vmatmul.mubr.bf16.vlgmr.msra.gmra.mrb[4].mxu1 %v3658_v15 }
 0x366   :  { %v2172_v17 = vpop.permute.xlu1 %2171 }
 0x367   :  { %v2177_v18 = vrot.slane %v2172_v17, %v3117_v8 }
 0x3f7   :  { %v2092_v38 = vpop.f32.mrb[4].mxu1 }
 0x3f8   :  { %v2455_v61 = vadd.f32 %v2092_v38, %v1688_v57  ;;  %v2094_v62 = vpop.f32.mrb[5].mxu1 }
 0x3f9   :  { %v2456_v0 = vadd.f32 %v2094_v62, %v1692_v59  ;;  %v2096_v1 = vpop.f32.mrb[6].mxu1 }
 0x3fa   :  { %v2101_v3 = vmax.f32 %v2455_v61, 0.0  ;;  %v2457_v5 = vadd.f32 %v2096_v1, %v1688_v57  ;;  %v2098_v6 = vpop.f32.mrb[7].mxu1 }
 0x3fb   :  { %v2102_v7 = vmax.f32 %v2456_v0, 0.0  ;;  %v2458_v4 = vadd.f32 %v2098_v6, %v1692_v59 }
 0x3fc   :  { %v2103_v48 = vmax.f32 %v2457_v5, 0.0  ;;  %v2126_v9 = vmul.f32 %v2121_v63, %v2101_v3 }
 0x3fd   :  { %v2104_v11 = vmax.f32 %v2458_v4, 0.0  ;;  %v2127_v10 = vmul.f32 %v2125_v2, %v2102_v7 }
 0x3fe   :  { %v2128_v12 = vmul.f32 %v2121_v63, %v2103_v48 }
 0x3ff   :  { %v2129_v47 = vmul.f32 %v2125_v2, %v2104_v11  ;;  %v2130_v13 = vadd.f32 %v2127_v10, %v2126_v9 }
 0x401   :  { %2131 = vadd.xlane.f32.xlu0 %v2130_v13  ;;  %v2133_v14 = vadd.f32 %v2129_v47, %v2128_v12 }
 0x405   :  { %2134 = vadd.xlane.f32.xlu0 %v2133_v14 }
 0x48e   :  { %v2132_v15 = vpop.xlane.xlu0 %2131 }
 0x48f   :  { %2136 = vxpose.xlu1.b32.start [1/2] (short) (narrow) %v2132_v15, 8 }
 0x492   :  { %v2135_v16 = vpop.xlane.xlu0 %2134 }
 0x493   :  { %2137 = vxpose.xlu1.b32.end [2/2] (short) (narrow) %v2135_v16, 8 }
 0x50f   :  { %v2152_v19 = vpop.trf.xlu1 }
 0x510   :  { %v2178_v20 = vadd.f32 %v2177_v18, %v2152_v19 }
 0x512   :  { %2180 = vst.msk [vmem:[%s3784_s11] sm:$0x1] %vm2179_vm3, %v2178_v20 }

</bundles_post_ra>
